<compile_context>
chip_gen: v5e
topology: v5e:2x2
jax: 0.10.0
libtpu: 0.0.40
codegen_flags: <defaults>
</compile_context>

<pallas_src>
import jax
import jax.numpy as jnp
from jax.experimental import pallas as pl
from jax.experimental.pallas import tpu as pltpu

INPUT_SIZE = 7
OUTPUT_SIZE = 1
HIDDEN = 128
LAYERS = 4

PADDED_OUT = 128   # layer-4 N padded to full lane width for the MXU only
MAX_TILE_B = 2048  # rows per grid step for large batches (multiple of 8)


def _round_up(n, m):
    return ((n + m - 1) // m) * m


def _sigmoid(h):
    # logistic(x) == 0.5 * (tanh(x/2) + 1): a single EUP transcendental per
    # element instead of exp + reciprocal.
    return 0.5 * (jnp.tanh(0.5 * h) + 1.0)


def mlp_kernel(x_ref,
               w1_ref, b1_ref,
               w2_ref, b2_ref,
               w3_ref, b3_ref,
               w4_ref, b4_ref,
               o_ref):
    # Layer 1: (TB, 7) bf16 @ (7, 128) bf16 -> f32, + bias, sigmoid.
    h = jnp.dot(x_ref[...].astype(jnp.bfloat16), w1_ref[...],
                preferred_element_type=jnp.float32)
    h = _sigmoid(h + b1_ref[...])
    # Layer 2: (TB, 128) @ (128, 128)
    h = jnp.dot(h.astype(jnp.bfloat16), w2_ref[...],
                preferred_element_type=jnp.float32)
    h = _sigmoid(h + b2_ref[...])
    # Layer 3: (TB, 128) @ (128, 128)
    h = jnp.dot(h.astype(jnp.bfloat16), w3_ref[...],
                preferred_element_type=jnp.float32)
    h = _sigmoid(h + b3_ref[...])
    # Layer 4 (no activation): matmul on 128 padded lanes, but only the real
    # column 0 is stored (output block is (TB, 1)).
    out = jnp.dot(h.astype(jnp.bfloat16), w4_ref[...],
                  preferred_element_type=jnp.float32)
    o_ref[...] = (out[:, :OUTPUT_SIZE] + b4_ref[...]).astype(o_ref.dtype)


def mlp_forward(x, params, max_tile_b=MAX_TILE_B):
    """x: (B, INPUT_SIZE) float32. params: list of (W, b) with W in [in, out]."""
    B = x.shape[0]

    # Tile choice: multiple of 8, capped at max_tile_b, and arranged so that a
    # large batch produces at least 2 grid steps (v7x megacore sharding).
    b_req = _round_up(max(B, 1), 8)
    tile_b = max(8, min(max_tile_b, _round_up(pl.cdiv(b_req, 2), 8)))
    grid = (pl.cdiv(B, tile_b),)

    (w1, b1), (w2, b2), (w3, b3), (w4, b4) = params
    # bf16 weights (f32 biases, added to the f32 accumulator).
    w1b = w1.astype(jnp.bfloat16)
    w2b = w2.astype(jnp.bfloat16)
    w3b = w3.astype(jnp.bfloat16)
    # Pad layer-4 N (1 -> 128) for an MXU-native matmul; only col 0 is real.
    w4b = jnp.zeros((HIDDEN, PADDED_OUT), jnp.bfloat16).at[:, :OUTPUT_SIZE].set(
        w4.astype(jnp.bfloat16))

    flat = [w1b, b1, w2b, b2, w3b, b3, w4b, b4]

    x_spec = pl.BlockSpec((tile_b, INPUT_SIZE), lambda i: (i, 0))
    out_spec = pl.BlockSpec((tile_b, OUTPUT_SIZE), lambda i: (i, 0))
    # Weights/biases: full-array blocks, constant index_map -> resident in VMEM
    # across all grid steps.
    weight_specs = [pl.BlockSpec(a.shape, lambda i: (0, 0)) for a in flat]

    flops = 2 * B * (INPUT_SIZE * HIDDEN
                     + 2 * HIDDEN * HIDDEN
                     + HIDDEN * OUTPUT_SIZE)
    transcendentals = 3 * B * HIDDEN
    bytes_accessed = (4 * B * (INPUT_SIZE + OUTPUT_SIZE)
                      + sum(int(a.size) * a.dtype.itemsize for a in flat))

    out = pl.pallas_call(
        mlp_kernel,
        out_shape=jax.ShapeDtypeStruct((B, OUTPUT_SIZE), jnp.float32),
        grid=grid,
        in_specs=[x_spec] + weight_specs,
        out_specs=out_spec,
        compiler_params=pltpu.CompilerParams(
            dimension_semantics=("parallel",)),
        cost_estimate=pl.CostEstimate(
            flops=flops,
            transcendentals=transcendentals,
            bytes_accessed=bytes_accessed),
    )(x, *flat)
    return out


def init_params(key):
    """Deterministic init mirroring nn.Linear shapes (stored as [in, out])."""
    sizes_in = [HIDDEN] * LAYERS
    sizes_out = [HIDDEN] * LAYERS
    sizes_in[0] = INPUT_SIZE
    sizes_out[-1] = OUTPUT_SIZE

    params = []
    for d_in, d_out in zip(sizes_in, sizes_out):
        key, kw, kb = jax.random.split(key, 3)
        bound = 1.0 / (d_in ** 0.5)  # same scale as PyTorch default init
        w = jax.random.uniform(kw, (d_in, d_out), jnp.float32, -bound, bound)
        b = jax.random.uniform(kb, (1, d_out), jnp.float32, -bound, bound)
        params.append((w, b))
    return params


def reference_forward_f32(x, params):
    """PyTorch-semantics (pure f32) reference."""
    h = x
    for i, (w, b) in enumerate(params):
        h = h @ w + b
        if i < len(params) - 1:
            h = jax.nn.sigmoid(h)
    return h


def reference_forward_mixed(x, params):
    """Mirrors the kernel numerics: bf16 dot inputs, f32 accumulate, tanh sigmoid."""
    h = x
    for i, (w, b) in enumerate(params):
        h = jnp.dot(h.astype(jnp.bfloat16), w.astype(jnp.bfloat16),
                    preferred_element_type=jnp.float32) + b
        if i < len(params) - 1:
            h = _sigmoid(h)
    return h


if __name__ == "__main__":
    key = jax.random.PRNGKey(0)
    key, kx = jax.random.split(key)
    batch = 8
    x = jax.random.normal(kx, (batch, INPUT_SIZE), jnp.float32)

    params = init_params(key)

    out = jax.block_until_ready(mlp_forward(x, params))
    assert out.shape == (batch, OUTPUT_SIZE)
    # Tight check against a reference with identical mixed-precision numerics,
    # loose check against the pure-f32 (PyTorch-semantics) reference.
    assert jnp.allclose(out, reference_forward_mixed(x, params),
                        atol=1e-2, rtol=1e-2)
    assert jnp.allclose(out, reference_forward_f32(x, params),
                        atol=5e-2, rtol=5e-2)

    # Multi-step grid + ragged last tile (B not a multiple of the tile).
    batch2 = 20
    key, kx2 = jax.random.split(key)
    x2 = jax.random.normal(kx2, (batch2, INPUT_SIZE), jnp.float32)
    out2 = jax.block_until_ready(mlp_forward(x2, params, max_tile_b=16))
    assert out2.shape == (batch2, OUTPUT_SIZE)
    assert jnp.allclose(out2, reference_forward_mixed(x2, params),
                        atol=1e-2, rtol=1e-2)
    assert jnp.allclose(out2, reference_forward_f32(x2, params),
                        atol=5e-2, rtol=5e-2)

    print("KERNEL_OK")
</pallas_src>

<mosaic_0001>
module attributes {stable_mosaic.version = 11 : i64} {
  func.func @mlp_kernel(%arg0: i32, %arg1: memref<8x7xf32, #tpu.memory_space<vmem>>, %arg2: memref<7x128xbf16, #tpu.memory_space<vmem>>, %arg3: memref<1x128xf32, #tpu.memory_space<vmem>>, %arg4: memref<128x128xbf16, #tpu.memory_space<vmem>>, %arg5: memref<1x128xf32, #tpu.memory_space<vmem>>, %arg6: memref<128x128xbf16, #tpu.memory_space<vmem>>, %arg7: memref<1x128xf32, #tpu.memory_space<vmem>>, %arg8: memref<128x128xbf16, #tpu.memory_space<vmem>>, %arg9: memref<1x1xf32, #tpu.memory_space<vmem>>, %arg10: memref<8x1xf32, #tpu.memory_space<vmem>>) attributes {dimension_semantics = [#tpu.dimension_semantics<parallel>], iteration_bounds = array<i64: 1>, scalar_prefetch = 0 : i64, scratch_operands = 0 : i64, tpu.core_type = #tpu.core_type<tc>, window_params = [{transform_indices = @transform_0, window_bounds = array<i64: 8, 7>}, {pipeline_mode = #tpu.pipeline_mode<synchronous>, transform_indices = @transform_1, window_bounds = array<i64: 7, 128>}, {pipeline_mode = #tpu.pipeline_mode<synchronous>, transform_indices = @transform_2, window_bounds = array<i64: 1, 128>}, {pipeline_mode = #tpu.pipeline_mode<synchronous>, transform_indices = @transform_3, window_bounds = array<i64: 128, 128>}, {pipeline_mode = #tpu.pipeline_mode<synchronous>, transform_indices = @transform_4, window_bounds = array<i64: 1, 128>}, {pipeline_mode = #tpu.pipeline_mode<synchronous>, transform_indices = @transform_5, window_bounds = array<i64: 128, 128>}, {pipeline_mode = #tpu.pipeline_mode<synchronous>, transform_indices = @transform_6, window_bounds = array<i64: 1, 128>}, {pipeline_mode = #tpu.pipeline_mode<synchronous>, transform_indices = @transform_7, window_bounds = array<i64: 128, 128>}, {pipeline_mode = #tpu.pipeline_mode<synchronous>, transform_indices = @transform_8, window_bounds = array<i64: 1, 1>}, {transform_indices = @transform_9, window_bounds = array<i64: 8, 1>}]} {
    %c0 = arith.constant 0 : index
    %c0_0 = arith.constant 0 : index
    %0 = vector.load %arg1[%c0, %c0_0] : memref<8x7xf32, #tpu.memory_space<vmem>>, vector<8x7xf32>
    %1 = arith.truncf %0 : vector<8x7xf32> to vector<8x7xbf16>
    %c0_1 = arith.constant 0 : index
    %c0_2 = arith.constant 0 : index
    %2 = vector.load %arg2[%c0_1, %c0_2] : memref<7x128xbf16, #tpu.memory_space<vmem>>, vector<7x128xbf16>
    %cst = arith.constant dense<0.000000e+00> : vector<8x128xf32>
    %3 = tpu.matmul %1, %2, %cst {dimension_numbers = #tpu.dot_dimension_numbers<[1], [0], [0], [1], [0, 0, 1, 1], [], []>} : vector<8x7xbf16>, vector<7x128xbf16>, vector<8x128xf32> -> vector<8x128xf32>
    %c0_3 = arith.constant 0 : index
    %c0_4 = arith.constant 0 : index
    %4 = vector.load %arg3[%c0_3, %c0_4] : memref<1x128xf32, #tpu.memory_space<vmem>>, vector<1x128xf32>
    %5 = vector.broadcast %4 : vector<1x128xf32> to vector<8x128xf32>
    %6 = arith.addf %3, %5 : vector<8x128xf32>
    %cst_5 = arith.constant 5.000000e-01 : f32
    %7 = vector.broadcast %cst_5 : f32 to vector<8x128xf32>
    %8 = arith.mulf %7, %6 : vector<8x128xf32>
    %9 = math.tanh %8 : vector<8x128xf32>
    %cst_6 = arith.constant 1.000000e+00 : f32
    %10 = vector.broadcast %cst_6 : f32 to vector<8x128xf32>
    %11 = arith.addf %9, %10 : vector<8x128xf32>
    %cst_7 = arith.constant 5.000000e-01 : f32
    %12 = vector.broadcast %cst_7 : f32 to vector<8x128xf32>
    %13 = arith.mulf %12, %11 : vector<8x128xf32>
    %14 = arith.truncf %13 : vector<8x128xf32> to vector<8x128xbf16>
    %c0_8 = arith.constant 0 : index
    %c0_9 = arith.constant 0 : index
    %15 = vector.load %arg4[%c0_8, %c0_9] : memref<128x128xbf16, #tpu.memory_space<vmem>>, vector<128x128xbf16>
    %cst_10 = arith.constant dense<0.000000e+00> : vector<8x128xf32>
    %16 = tpu.matmul %14, %15, %cst_10 {dimension_numbers = #tpu.dot_dimension_numbers<[1], [0], [0], [1], [0, 0, 1, 1], [], []>} : vector<8x128xbf16>, vector<128x128xbf16>, vector<8x128xf32> -> vector<8x128xf32>
    %c0_11 = arith.constant 0 : index
    %c0_12 = arith.constant 0 : index
    %17 = vector.load %arg5[%c0_11, %c0_12] : memref<1x128xf32, #tpu.memory_space<vmem>>, vector<1x128xf32>
    %18 = vector.broadcast %17 : vector<1x128xf32> to vector<8x128xf32>
    %19 = arith.addf %16, %18 : vector<8x128xf32>
    %cst_13 = arith.constant 5.000000e-01 : f32
    %20 = vector.broadcast %cst_13 : f32 to vector<8x128xf32>
    %21 = arith.mulf %20, %19 : vector<8x128xf32>
    %22 = math.tanh %21 : vector<8x128xf32>
    %cst_14 = arith.constant 1.000000e+00 : f32
    %23 = vector.broadcast %cst_14 : f32 to vector<8x128xf32>
    %24 = arith.addf %22, %23 : vector<8x128xf32>
    %cst_15 = arith.constant 5.000000e-01 : f32
    %25 = vector.broadcast %cst_15 : f32 to vector<8x128xf32>
    %26 = arith.mulf %25, %24 : vector<8x128xf32>
    %27 = arith.truncf %26 : vector<8x128xf32> to vector<8x128xbf16>
    %c0_16 = arith.constant 0 : index
    %c0_17 = arith.constant 0 : index
    %28 = vector.load %arg6[%c0_16, %c0_17] : memref<128x128xbf16, #tpu.memory_space<vmem>>, vector<128x128xbf16>
    %cst_18 = arith.constant dense<0.000000e+00> : vector<8x128xf32>
    %29 = tpu.matmul %27, %28, %cst_18 {dimension_numbers = #tpu.dot_dimension_numbers<[1], [0], [0], [1], [0, 0, 1, 1], [], []>} : vector<8x128xbf16>, vector<128x128xbf16>, vector<8x128xf32> -> vector<8x128xf32>
    %c0_19 = arith.constant 0 : index
    %c0_20 = arith.constant 0 : index
    %30 = vector.load %arg7[%c0_19, %c0_20] : memref<1x128xf32, #tpu.memory_space<vmem>>, vector<1x128xf32>
    %31 = vector.broadcast %30 : vector<1x128xf32> to vector<8x128xf32>
    %32 = arith.addf %29, %31 : vector<8x128xf32>
    %cst_21 = arith.constant 5.000000e-01 : f32
    %33 = vector.broadcast %cst_21 : f32 to vector<8x128xf32>
    %34 = arith.mulf %33, %32 : vector<8x128xf32>
    %35 = math.tanh %34 : vector<8x128xf32>
    %cst_22 = arith.constant 1.000000e+00 : f32
    %36 = vector.broadcast %cst_22 : f32 to vector<8x128xf32>
    %37 = arith.addf %35, %36 : vector<8x128xf32>
    %cst_23 = arith.constant 5.000000e-01 : f32
    %38 = vector.broadcast %cst_23 : f32 to vector<8x128xf32>
    %39 = arith.mulf %38, %37 : vector<8x128xf32>
    %40 = arith.truncf %39 : vector<8x128xf32> to vector<8x128xbf16>
    %c0_24 = arith.constant 0 : index
    %c0_25 = arith.constant 0 : index
    %41 = vector.load %arg8[%c0_24, %c0_25] : memref<128x128xbf16, #tpu.memory_space<vmem>>, vector<128x128xbf16>
    %cst_26 = arith.constant dense<0.000000e+00> : vector<8x128xf32>
    %42 = tpu.matmul %40, %41, %cst_26 {dimension_numbers = #tpu.dot_dimension_numbers<[1], [0], [0], [1], [0, 0, 1, 1], [], []>} : vector<8x128xbf16>, vector<128x128xbf16>, vector<8x128xf32> -> vector<8x128xf32>
    %43 = vector.extract_strided_slice %42 {offsets = [0, 0], sizes = [8, 1], strides = [1, 1]} : vector<8x128xf32> to vector<8x1xf32>
    %c0_27 = arith.constant 0 : index
    %c0_28 = arith.constant 0 : index
    %44 = vector.load %arg9[%c0_27, %c0_28] : memref<1x1xf32, #tpu.memory_space<vmem>>, vector<1x1xf32>
    %45 = vector.broadcast %44 : vector<1x1xf32> to vector<8x1xf32>
    %46 = arith.addf %43, %45 : vector<8x1xf32>
    %c0_29 = arith.constant 0 : index
    %c0_30 = arith.constant 0 : index
    %47 = vector.load %arg10[%c0_29, %c0_30] : memref<8x1xf32, #tpu.memory_space<vmem>>, vector<8x1xf32>
    tpu.vector_store %arg10[%c0_29, %c0_30], %46 {strides = array<i32>} : memref<8x1xf32, #tpu.memory_space<vmem>>, vector<8x1xf32>,
    return
  }
  func.func @transform_0(%arg0: i32) -> (i32, i32) {
    %c0_i32 = arith.constant 0 : i32
    %c0_i32_0 = arith.constant 0 : i32
    return %arg0, %c0_i32 : i32, i32
  }
  func.func @transform_1(%arg0: i32) -> (i32, i32) {
    %c0_i32 = arith.constant 0 : i32
    %c0_i32_0 = arith.constant 0 : i32
    %c0_i32_1 = arith.constant 0 : i32
    return %c0_i32, %c0_i32_0 : i32, i32
  }
  func.func @transform_2(%arg0: i32) -> (i32, i32) {
    %c0_i32 = arith.constant 0 : i32
    %c0_i32_0 = arith.constant 0 : i32
    %c0_i32_1 = arith.constant 0 : i32
    return %c0_i32, %c0_i32_0 : i32, i32
  }
  func.func @transform_3(%arg0: i32) -> (i32, i32) {
    %c0_i32 = arith.constant 0 : i32
    %c0_i32_0 = arith.constant 0 : i32
    %c0_i32_1 = arith.constant 0 : i32
    return %c0_i32, %c0_i32_0 : i32, i32
  }
  func.func @transform_4(%arg0: i32) -> (i32, i32) {
    %c0_i32 = arith.constant 0 : i32
    %c0_i32_0 = arith.constant 0 : i32
    %c0_i32_1 = arith.constant 0 : i32
    return %c0_i32, %c0_i32_0 : i32, i32
  }
  func.func @transform_5(%arg0: i32) -> (i32, i32) {
    %c0_i32 = arith.constant 0 : i32
    %c0_i32_0 = arith.constant 0 : i32
    %c0_i32_1 = arith.constant 0 : i32
    return %c0_i32, %c0_i32_0 : i32, i32
  }
  func.func @transform_6(%arg0: i32) -> (i32, i32) {
    %c0_i32 = arith.constant 0 : i32
    %c0_i32_0 = arith.constant 0 : i32
    %c0_i32_1 = arith.constant 0 : i32
    return %c0_i32, %c0_i32_0 : i32, i32
  }
  func.func @transform_7(%arg0: i32) -> (i32, i32) {
    %c0_i32 = arith.constant 0 : i32
    %c0_i32_0 = arith.constant 0 : i32
    %c0_i32_1 = arith.constant 0 : i32
    return %c0_i32, %c0_i32_0 : i32, i32
  }
  func.func @transform_8(%arg0: i32) -> (i32, i32) {
    %c0_i32 = arith.constant 0 : i32
    %c0_i32_0 = arith.constant 0 : i32
    %c0_i32_1 = arith.constant 0 : i32
    return %c0_i32, %c0_i32_0 : i32, i32
  }
  func.func @transform_9(%arg0: i32) -> (i32, i32) {
    %c0_i32 = arith.constant 0 : i32
    %c0_i32_0 = arith.constant 0 : i32
    return %arg0, %c0_i32 : i32, i32
  }
}

</mosaic_0001>

<bundles_post_ra>
// kernel: tpu_custom_call.1
= control target key start
LH: loop header
LB: loop body
LE: loop exit
PB: predicated region body
PF: predicated region fallthrough
CT: control target
= control target key end

     0   :  { %s761_s0 = inlined_call_operand.hbm [shape: f32[8,7], index: 0, kind: input, shape index: {}]   ;;  %s762_s1 = inlined_call_operand.hbm [shape: bf16[7,128], index: 1, kind: input, shape index: {}]   ;;  %s763_s2 = inlined_call_operand.vmem [shape: f32[1,128], index: 2, kind: input, shape index: {}]   ;;  %s764_s3 = inlined_call_operand.hbm [shape: bf16[128,128], index: 3, kind: input, shape index: {}]   ;;  %s765_s4 = inlined_call_operand.vmem [shape: f32[1,128], index: 4, kind: input, shape index: {}]   ;;  %s766_s5 = inlined_call_operand.hbm [shape: bf16[128,128], index: 5, kind: input, shape index: {}]   ;;  %s767_s6 = inlined_call_operand.vmem [shape: f32[1,128], index: 6, kind: input, shape index: {}]   ;;  %s768_s7 = inlined_call_operand.hbm [shape: bf16[128,128], index: 7, kind: input, shape index: {}]   ;;  %s769_s8 = inlined_call_operand.<no memory space> [shape: f32[1,1], index: 8, kind: input, shape index: {}]   ;;  %s770_s9 = inlined_call_operand.vmem [shape: f32[8,1], index: 9, kind: output, shape index: {}]  }
   0x1   :  { %v14_v0 = vstv %s769_s8 }
   0x2   :  { %15 = vst [vmem:[#allocation2] sm:$0x1] %v14_v0 }
   0x3   :  { %16 = vsyncpa [#allocation4], 0 }
   0x4   :  { %17 = vsyncpa [#allocation6], 0  ;;  %s35_s13 = sshll.u32 %s762_s1, 4  ;;  %s36_s13 = int_to_ptr.hbm [resolvable:$true] %s35_s13 }
   0x5   :  { %18 = vsyncpa [#allocation9], 0  ;;  %s673_s14 = smov [#allocation5]   ;;  %s62_s18 = sshll.u32 %s766_s5, 4  ;;  %s63_s18 = int_to_ptr.hbm [resolvable:$true] %s62_s18 }
   0x6   :  { %s37_s15 = sshll.u32 %s673_s14, 4  ;;  %s674_s19 = smov [#allocation8]   ;;  %s38_s15 = int_to_ptr.vmem [resolvable:$true] %s37_s15 }
   0x7   :  { %40 = dma.hbm_to_vmem [thread:$0]  %s36_s13, 64, %s38_s15, [#allocation6]  }
   0x8   :  { %s64_s8 = sshll.u32 %s674_s19, 4  ;;  %s24_s22 = sshll.u32 %s761_s0, 4  ;;  %s65_s8 = int_to_ptr.vmem [resolvable:$true] %s64_s8  ;;  %s25_s22 = int_to_ptr.hbm [resolvable:$true] %s24_s22 }
   0x9   :  { %s675_s1 = smov 64   ;;  %s676_s23 = smov 4  }
   0xa   :  { %70 = dma.hbm_to_vmem [thread:$0]  %s63_s18, 1024, %s65_s8, [#allocation9], %s675_s1, %s675_s1, %s676_s23  }
   0xb   :  { %s47_s26 = sshll.u32 %s764_s3, 4  ;;  %s677_s27 = smov [#allocation3]   ;;  %s48_s26 = int_to_ptr.hbm [resolvable:$true] %s47_s26 }
   0xc   :  { %s26_s28 = sshll.u32 %s677_s27, 4  ;;  %s678_s5 = smov [#allocation7]   ;;  %s27_s28 = int_to_ptr.vmem [resolvable:$true] %s26_s28 }
   0xd   :  { %29 = dma.hbm_to_vmem [thread:$0]  %s25_s22, 128, %s27_s28, [#allocation4]  }
   0xe   :  { %s49_s29 = sshll.u32 %s678_s5, 4  ;;  %s77_s0 = sshll.u32 %s768_s7, 4  ;;  %s50_s29 = int_to_ptr.vmem [resolvable:$true] %s49_s29  ;;  %s78_s0 = int_to_ptr.hbm [resolvable:$true] %s77_s0 }
   0xf   :  { %55 = dma.hbm_to_vmem [thread:$0]  %s48_s26, 1024, %s50_s29, [#allocation6], %s675_s1, %s675_s1, %s676_s23  }
  0x10   :  { %s679_s11 = smov [#allocation10]  }
  0x11   :  { %s79_s12 = sshll.u32 %s679_s11, 4  ;;  %s80_s12 = int_to_ptr.vmem [resolvable:$true] %s79_s12 }
  0x12   :  { %85 = dma.hbm_to_vmem [thread:$0]  %s78_s0, 1024, %s80_s12, [#allocation9], %s675_s1, %s675_s1, %s676_s23  }
  0x13   :  { %667 = dma.done.wait [#allocation4], 128  }
  0x14   :  { %668 = vsyncadd [#allocation4], 4294967168 }
  0x15   :  { %669 = dma.done.wait [#allocation6], 1088  }
  0x16   :  { %670 = vsyncadd [#allocation6], 4294966208 }
  0x17   :  { %671 = dma.done.wait [#allocation9], 2048  }
  0x18   :  { %672 = vsyncadd [#allocation9], 4294965248  ;;  %vm120_vm0 = vcmask 1042432   ;;  %vm121_vm1 = vcmask 1043456   ;;  %v680_v1 = vmov 65535   ;;  %v109_v5 = vld [vmem:[#allocation3] sm:$0xff] }
  0x19   :  { %v122_v2 = vsel %vm120_vm0, 4294967295, %v680_v1  ;;  %v111_v4 = vld [vmem:[#allocation5] sm:$0xf]  ;;  %v110_v8 = vpack.c.bf16 %v109_v5, %v109_v5  ;;  %v511_v9 = vld [vmem:[#allocation7 + $0x30] sm:$0xff]  ;;  %vm116_vm2 = vcmask 56320   ;;  %v510_v10 = vld [vmem:[#allocation7 + $0x28] sm:$0xff] }
  0x1a   :  { %v123_v3 = vsel %vm121_vm1, %v122_v2, 0  ;;  %v512_v6 = vld [vmem:[#allocation7 + $0x38] sm:$0xff]  ;;  %v509_v11 = vld [vmem:[#allocation7 + $0x20] sm:$0xff]  ;;  %v507_v13 = vld [vmem:[#allocation7 + $0x10] sm:$0xff]  ;;  %vm399_vm3 = vcmask 7168  }
  0x1b   :  { %v125_v7 = vand.u32 %v123_v3, %v111_v4  ;;  %213 = vmatpush.bf16.msra.mxu1 %v512_v6  ;;  %v508_v12 = vld [vmem:[#allocation7 + $0x18] sm:$0xff]  ;;  %v506_v14 = vld [vmem:[#allocation7 + $0x8] sm:$0xff]  ;;  %v505_v15 = vld [vmem:[#allocation7] sm:$0xff] }
  0x1c   :  { %v520_v16 = vld [vmem:[#allocation8 + $0x38] sm:$0xff]  ;;  %v519_v17 = vld [vmem:[#allocation8 + $0x30] sm:$0xff]  ;;  %v518_v18 = vld [vmem:[#allocation8 + $0x28] sm:$0xff] }
  0x1d   :  { %134 = vmatpush.bf16.msra.mxu0 %v125_v7  ;;  %299 = vmatpush.bf16.msra.mxu2 %v520_v16  ;;  %v517_v19 = vld [vmem:[#allocation8 + $0x20] sm:$0xff]  ;;  %v537_v20 = vld [vmem:[%s763_s2] ss:$0 sm:$0xff]  ;;  %v516_v29 = vld [vmem:[#allocation8 + $0x18] sm:$0xff] }
  0x1e   :  { %v515_v30 = vld [vmem:[#allocation8 + $0x10] sm:$0xff]  ;;  %v514_v31 = vld [vmem:[#allocation8 + $0x8] sm:$0xff]  ;;  %v513_v32 = vld [vmem:[#allocation8] sm:$0xff] }
  0x1f   :  { %214 = vmatpush.bf16.msra.mxu1 %v511_v9  ;;  %v528_v33 = vld [vmem:[#allocation10 + $0x38] sm:$0xff]  ;;  %v527_v34 = vld [vmem:[#allocation10 + $0x30] sm:$0xff]  ;;  %v526_v35 = vld [vmem:[#allocation10 + $0x28] sm:$0xff] }
  0x20   :  { %408 = vmatmul.msk.bf16.vlgmr.msra.gmra.mxu0 %vm116_vm2, %v110_v8  ;;  %381 = vmatpush.bf16.msra.mxu3 %v528_v33  ;;  %v525_v36 = vld [vmem:[#allocation10 + $0x20] sm:$0xff]  ;;  %v538_v37 = vld [vmem:[%s765_s4] ss:$0 sm:$0xff]  ;;  %v524_v46 = vld [vmem:[#allocation10 + $0x18] sm:$0xff] }
  0x21   :  { %300 = vmatpush.bf16.msra.mxu2 %v519_v17  ;;  %v523_v47 = vld [vmem:[#allocation10 + $0x10] sm:$0xff]  ;;  %v522_v48 = vld [vmem:[#allocation10 + $0x8] sm:$0xff]  ;;  %v521_v49 = vld [vmem:[#allocation10] sm:$0xff] }
  0x22   :  { %v539_v50 = vld [vmem:[%s767_s6] ss:$0 sm:$0xff] }
  0x23   :  { %215 = vmatpush.bf16.msra.mxu1 %v510_v10  ;;  %v540_v59 = vld [vmem:[#allocation2] ss:$0 sm:$0xff] }
  0x24   :  { %382 = vmatpush.bf16.msra.mxu3 %v527_v34 }
  0x25   :  { %301 = vmatpush.bf16.msra.mxu2 %v518_v18 }
  0x27   :  { %216 = vmatpush.bf16.msra.mxu1 %v509_v11 }
  0x28   :  { %383 = vmatpush.bf16.msra.mxu3 %v526_v35 }
  0x29   :  { %302 = vmatpush.bf16.msra.mxu2 %v517_v19 }
  0x2b   :  { %217 = vmatpush.bf16.msra.mxu1 %v508_v12 }
  0x2c   :  { %384 = vmatpush.bf16.msra.mxu3 %v525_v36 }
  0x2d   :  { %303 = vmatpush.bf16.msra.mxu2 %v516_v29 }
  0x2f   :  { %218 = vmatpush.bf16.msra.mxu1 %v507_v13 }
  0x30   :  { %385 = vmatpush.bf16.msra.mxu3 %v524_v46 }
  0x31   :  { %304 = vmatpush.bf16.msra.mxu2 %v515_v30 }
  0x33   :  { %219 = vmatpush.bf16.msra.mxu1 %v506_v14 }
  0x34   :  { %386 = vmatpush.bf16.msra.mxu3 %v523_v47 }
  0x35   :  { %305 = vmatpush.bf16.msra.mxu2 %v514_v31 }
  0x37   :  { %220 = vmatpush.bf16.msra.mxu1 %v505_v15 }
  0x38   :  { %387 = vmatpush.bf16.msra.mxu3 %v522_v48 }
  0x39   :  { %306 = vmatpush.bf16.msra.mxu2 %v513_v32 }
  0x3c   :  { %388 = vmatpush.bf16.msra.mxu3 %v521_v49 }
  0x9d   :  { %v136_v21 = vpop.f32.mrf.mxu0 }
  0x9e   :  { %v137_v22 = vadd.f32 %v537_v20, %v136_v21 }
  0xa0   :  { %v140_v23 = vmul.f32 0.5, %v137_v22 }
  0xa2   :  { %541 = vtanh.f32 %v140_v23 }
  0xa5   :  { %v138_v24 = vpop.f32.mrf.mxu0 }
  0xa8   :  { %v542_v25 = vpop.eup %541 }
  0xa9   :  { %v142_v26 = vadd.f32 1.0, %v542_v25 }
  0xab   :  { %v143_v27 = vmul.f32 0.5, %v142_v26 }
  0xad   :  { %v144_v28 = vpack.c.bf16 %v143_v27, %v143_v27 }
  0xaf   :  { %221 = vmatmul.bf16.vlgmr.msra.gmra.mxu1 %v144_v28 }
 0x12c   :  { %v222_v38 = vpop.f32.mrf.mxu1 }
 0x12d   :  { %v223_v39 = vadd.f32 %v538_v37, %v222_v38 }
 0x12f   :  { %v226_v40 = vmul.f32 0.5, %v223_v39 }
 0x131   :  { %543 = vtanh.f32 %v226_v40 }
 0x134   :  { %v224_v41 = vpop.f32.mrf.mxu1 }
 0x137   :  { %v544_v42 = vpop.eup %543 }
 0x138   :  { %v228_v43 = vadd.f32 1.0, %v544_v42 }
 0x13a   :  { %v229_v44 = vmul.f32 0.5, %v228_v43 }
 0x13c   :  { %v230_v45 = vpack.c.bf16 %v229_v44, %v229_v44 }
 0x13e   :  { %307 = vmatmul.bf16.vlgmr.msra.gmra.mxu2 %v230_v45 }
 0x1c1   :  { %v308_v51 = vpop.f32.mrf.mxu2 }
 0x1c2   :  { %v309_v52 = vadd.f32 %v539_v50, %v308_v51 }
 0x1c4   :  { %v312_v53 = vmul.f32 0.5, %v309_v52 }
 0x1c6   :  { %545 = vtanh.f32 %v312_v53 }
 0x1c9   :  { %v310_v54 = vpop.f32.mrf.mxu2 }
 0x1cc   :  { %v546_v55 = vpop.eup %545 }
 0x1cd   :  { %v314_v56 = vadd.f32 1.0, %v546_v55 }
 0x1cf   :  { %v315_v57 = vmul.f32 0.5, %v314_v56 }
 0x1d1   :  { %v316_v58 = vpack.c.bf16 %v315_v57, %v315_v57 }
 0x1d3   :  { %389 = vmatmul.bf16.vlgmr.msra.gmra.mxu3 %v316_v58 }
 0x256   :  { %v390_v60 = vpop.f32.mrf.mxu3 }
 0x257   :  { %v398_v61 = vadd.f32 %v540_v59, %v390_v60 }
 0x259   :  { %400 = vst.msk [vmem:[%s770_s9] sm:$0xff] %vm399_vm3, %v398_v61 }
 0x25e   :  { %v392_v62 = vpop.f32.mrf.mxu3 }
 0x25f   :  { %405 = vsyncpa [#allocation4], 1 }
 0x260   :  { %406 = vsyncpa [#allocation6], 1 }
 0x261   :  { %407 = vsyncpa [#allocation9], 1 }

</bundles_post_ra>
